<compile_context>
chip_gen: v7x
topology: tpu7x:2x2x1
jax: 0.10.0
libtpu: 0.0.40
codegen_flags: <defaults>
</compile_context>

<pallas_src>
import jax
import jax.numpy as jnp
from jax import lax
from jax.experimental import pallas as pl
from jax.experimental.pallas import tpu as pltpu

_LANES = 128      # vreg lane width
_ROW_CHUNK = 64   # rows per in-kernel chunk: (64, 128) f32 = 8 vregs per live array


def _round_up(x, m):
    return ((x + m - 1) // m) * m


def _cdiv(a, b):
    return -(-a // b)


def _make_argmax_kernel(C, R_block, RC):
    """Channel-argmax over a (C, R_block, 128) VMEM block, RC rows at a time."""
    assert R_block % RC == 0
    n_chunks = R_block // RC
    unroll_channels = C <= 32

    def kernel(idx_ref, x_ref, out_ref):
        # idx_ref: SMEM scalar prefetch (batch index; consumed by the index_map).
        # x_ref  : (C, R_block, 128) logits of the selected batch element, native dtype.
        # out_ref: (R_block, 128) int32 argmax over the channel axis.
        # Strict '>' gives first-occurrence tie-break, matching torch/numpy argmax.
        del idx_ref

        def do_chunk(r0):
            rows = pl.ds(r0, RC)
            best_val = x_ref[0, rows, :]                      # (RC, 128), sublane-dense
            best_idx = jnp.zeros(best_val.shape, jnp.int32)
            if unroll_channels:
                for c in range(1, C):                         # static unroll, one slice live
                    xc = x_ref[c, rows, :]
                    take = xc > best_val
                    best_val = jnp.where(take, xc, best_val)
                    best_idx = jnp.where(take, jnp.int32(c), best_idx)
            else:
                def body(c, carry):
                    bv, bi = carry
                    xc = x_ref[c, rows, :]
                    take = xc > bv
                    return (jnp.where(take, xc, bv), jnp.where(take, c, bi))
                best_val, best_idx = lax.fori_loop(1, C, body, (best_val, best_idx))
            out_ref[rows, :] = best_idx

        if n_chunks <= 16:
            # Static unroll: the LLO scheduler sees every load/cmp/select/store.
            for k in range(n_chunks):
                do_chunk(k * RC)
        else:
            @pl.loop(0, n_chunks)
            def _(k):
                do_chunk(pl.multiple_of(k * RC, RC))

    return kernel


def _pred_argmax_impl(tensor, idx):
    """argmax over the channel axis of tensor[idx] (NCHW), via a Pallas TPU kernel."""
    N, C, H, W = tensor.shape
    HW = H * W
    itemsize = jnp.dtype(tensor.dtype).itemsize
    HWp = _round_up(HW, _LANES)
    R_total = HWp // _LANES

    idx = jnp.clip(jnp.asarray(idx, jnp.int32), 0, N - 1)

    if HW % _LANES == 0:
        # Free (contiguous) reshape: the kernel DMAs only batch `idx` from HBM.
        x = tensor.reshape(N, C, R_total, _LANES)
        idx_arr = idx.reshape(1)
    else:
        # Tail pad needed for the lane-dense view: pad only the single selected
        # batch element (one small fused XLA copy), never the full N-batch tensor.
        xi = lax.dynamic_index_in_dim(tensor, idx, axis=0, keepdims=False)
        xi = jnp.pad(xi.reshape(C, HW), ((0, 0), (0, HWp - HW)))
        x = xi.reshape(1, C, R_total, _LANES)
        idx_arr = jnp.zeros((1,), jnp.int32)

    # --- block sizing --------------------------------------------------------
    RC = _ROW_CHUNK if R_total >= _ROW_CHUNK else R_total
    bytes_per_row = C * _LANES * itemsize
    if R_total <= RC:
        R_block = R_total
    else:
        target_block_bytes = 4 * 1024 * 1024                 # per-block input DMA target
        r_cap = max(RC, (target_block_bytes // bytes_per_row) // RC * RC)
        r_quarter = _round_up(_cdiv(R_total, 4), RC)          # >=4 blocks when possible
        R_block = max(RC, min(r_cap, r_quarter))
    num_blocks = _cdiv(R_total, R_block)

    in_block_bytes = C * R_block * _LANES * itemsize
    out_block_bytes = R_block * _LANES * 4
    # Double-buffered in + out blocks plus headroom; within every generation's
    # scoped-VMEM budget (v5e 16 MiB default, v6e 32/128 MiB, v7x 32/64 MiB per TC).
    vmem_limit = int(min(32 * 2**20,
                         max(8 * 2**20, 3 * (in_block_bytes + out_block_bytes))))

    cost = pl.CostEstimate(
        flops=3 * max(C - 1, 1) * HWp,                        # cmp + 2 selects per channel
        transcendentals=0,
        bytes_accessed=C * HWp * itemsize + HWp * 4)

    out = pl.pallas_call(
        _make_argmax_kernel(C, R_block, RC),
        out_shape=jax.ShapeDtypeStruct((R_total, _LANES), jnp.int32),
        grid_spec=pltpu.PrefetchScalarGridSpec(
            num_scalar_prefetch=1,
            grid=(num_blocks,),
            in_specs=[
                # Batch dim selected dynamically via the prefetched idx and squeezed
                # out of the kernel view; spatial rows tiled so the DMA of block i+1
                # overlaps the compares on block i.
                pl.BlockSpec((None, C, R_block, _LANES),
                             lambda i, idx_ref: (idx_ref[0], 0, i, 0)),
            ],
            out_specs=pl.BlockSpec((R_block, _LANES),
                                   lambda i, idx_ref: (i, 0)),
        ),
        compiler_params=pltpu.CompilerParams(
            dimension_semantics=("parallel",),                # megacore sharding on v7x
            vmem_limit_bytes=vmem_limit),
        cost_estimate=cost,
    )(idx_arr, x)

    # TODO(synk): optionally emit int16/uint8 indices for C <= 32767/255 to shave
    # the writeback bytes (needs the packed-dtype sublane tiling on the out spec).
    return out.reshape(HWp)[:HW].reshape(H, W)


_pred_argmax = jax.jit(_pred_argmax_impl)


def sample_matrix(tensor, t_type, idx=0):
    """JAX/Pallas equivalent of SampleMatrix.forward.

    Returns device arrays (the torch .detach().cpu().numpy() host transfer is
    left to the caller).
    """
    if t_type == 'pred':
        return _pred_argmax(tensor, idx)
    elif t_type == 'latent':
        return tensor[idx, 0, :, :]       # pure indexing, no compute -> plain JAX glue
    elif t_type == 'gt':
        return tensor[idx, :, :]
    else:
        raise ValueError(t_type)


if __name__ == "__main__":
    key = jax.random.PRNGKey(0)
    k1, k2, k3, k4, k5 = jax.random.split(key, 5)

    def ref_pred(x, idx):
        # Module semantics: argmax(softmax(x, dim=1), dim=1)[idx]
        return jnp.argmax(jax.nn.softmax(x.astype(jnp.float32), axis=1),
                          axis=1)[idx].astype(jnp.int32)

    # 1) Small shapes consistent with the module (NCHW logits, NHW gt).
    N, C, H, W = 2, 4, 16, 16
    logits = jax.random.normal(k1, (N, C, H, W), dtype=jnp.float32)
    gt = jax.random.randint(k2, (N, H, W), 0, C).astype(jnp.int32)
    idx = 1

    pred = jax.block_until_ready(sample_matrix(logits, 'pred', idx=idx))
    latent = jax.block_until_ready(sample_matrix(logits, 'latent', idx=idx))
    gtm = jax.block_until_ready(sample_matrix(gt, 'gt', idx=idx))
    assert pred.shape == (H, W) and pred.dtype == jnp.int32
    assert bool(jnp.all(pred == ref_pred(logits, idx)))
    assert latent.shape == (H, W) and gtm.shape == (H, W)

    # 2) Spatial size not a multiple of 128 -> single-batch-element pad path.
    logits2 = jax.random.normal(k3, (2, 8, 33, 65), dtype=jnp.float32)
    pred2 = jax.block_until_ready(sample_matrix(logits2, 'pred', idx=0))
    assert pred2.shape == (33, 65)
    assert bool(jnp.all(pred2 == ref_pred(logits2, 0)))

    # 3) Multi-block grid + multi-chunk inner loop, native bf16 inputs.
    logits3 = jax.random.normal(k4, (1, 6, 256, 512), dtype=jnp.bfloat16)
    pred3 = jax.block_until_ready(sample_matrix(logits3, 'pred', idx=0))
    assert pred3.shape == (256, 512)
    assert bool(jnp.all(pred3 == ref_pred(logits3, 0)))

    # 4) Large channel count -> in-kernel fori_loop over channels.
    logits4 = jax.random.normal(k5, (2, 40, 16, 16), dtype=jnp.float32)
    pred4 = jax.block_until_ready(sample_matrix(logits4, 'pred', idx=1))
    assert bool(jnp.all(pred4 == ref_pred(logits4, 1)))

    print("KERNEL_OK")
</pallas_src>

<mosaic_0001>
module attributes {stable_mosaic.version = 11 : i64} {
  func.func @kernel(%arg0: i32, %arg1: memref<1xi32, #tpu.memory_space<smem>>, %arg2: memref<1x4x2x128xf32, #tpu.memory_space<vmem>>, %arg3: memref<2x128xi32, #tpu.memory_space<vmem>>) attributes {dimension_semantics = [#tpu.dimension_semantics<parallel>], iteration_bounds = array<i64: 1>, scalar_prefetch = 1 : i64, scratch_operands = 0 : i64, tpu.core_type = #tpu.core_type<tc>, window_params = [{transform_indices = @transform_0, window_bounds = array<i64: 1, 4, 2, 128>}, {transform_indices = @transform_1, window_bounds = array<i64: 2, 128>}]} {
    %c0 = arith.constant 0 : index
    %c0_0 = arith.constant 0 : index
    %c0_1 = arith.constant 0 : index
    %c0_2 = arith.constant 0 : index
    %0 = vector.load %arg2[%c0, %c0_0, %c0_1, %c0_2] : memref<1x4x2x128xf32, #tpu.memory_space<vmem>>, vector<1x1x2x128xf32>
    %1 = vector.shape_cast %0 : vector<1x1x2x128xf32> to vector<2x128xf32>
    %c0_i32 = arith.constant 0 : i32
    %2 = vector.broadcast %c0_i32 : i32 to vector<2x128xi32>
    %c0_3 = arith.constant 0 : index
    %c1 = arith.constant 1 : index
    %c0_4 = arith.constant 0 : index
    %c0_5 = arith.constant 0 : index
    %3 = vector.load %arg2[%c0_3, %c1, %c0_4, %c0_5] : memref<1x4x2x128xf32, #tpu.memory_space<vmem>>, vector<1x1x2x128xf32>
    %4 = vector.shape_cast %3 : vector<1x1x2x128xf32> to vector<2x128xf32>
    %5 = arith.cmpf ogt, %4, %1 : vector<2x128xf32>
    %6 = arith.select %5, %4, %1 : vector<2x128xi1>, vector<2x128xf32>
    %c1_i32 = arith.constant 1 : i32
    %7 = vector.broadcast %c1_i32 : i32 to vector<2x128xi32>
    %8 = arith.select %5, %7, %2 : vector<2x128xi1>, vector<2x128xi32>
    %c0_6 = arith.constant 0 : index
    %c2 = arith.constant 2 : index
    %c0_7 = arith.constant 0 : index
    %c0_8 = arith.constant 0 : index
    %9 = vector.load %arg2[%c0_6, %c2, %c0_7, %c0_8] : memref<1x4x2x128xf32, #tpu.memory_space<vmem>>, vector<1x1x2x128xf32>
    %10 = vector.shape_cast %9 : vector<1x1x2x128xf32> to vector<2x128xf32>
    %11 = arith.cmpf ogt, %10, %6 : vector<2x128xf32>
    %12 = arith.select %11, %10, %6 : vector<2x128xi1>, vector<2x128xf32>
    %c2_i32 = arith.constant 2 : i32
    %13 = vector.broadcast %c2_i32 : i32 to vector<2x128xi32>
    %14 = arith.select %11, %13, %8 : vector<2x128xi1>, vector<2x128xi32>
    %c0_9 = arith.constant 0 : index
    %c3 = arith.constant 3 : index
    %c0_10 = arith.constant 0 : index
    %c0_11 = arith.constant 0 : index
    %15 = vector.load %arg2[%c0_9, %c3, %c0_10, %c0_11] : memref<1x4x2x128xf32, #tpu.memory_space<vmem>>, vector<1x1x2x128xf32>
    %16 = vector.shape_cast %15 : vector<1x1x2x128xf32> to vector<2x128xf32>
    %17 = arith.cmpf ogt, %16, %12 : vector<2x128xf32>
    %c3_i32 = arith.constant 3 : i32
    %18 = vector.broadcast %c3_i32 : i32 to vector<2x128xi32>
    %19 = arith.select %17, %18, %14 : vector<2x128xi1>, vector<2x128xi32>
    %c0_12 = arith.constant 0 : index
    %c0_13 = arith.constant 0 : index
    %20 = vector.load %arg3[%c0_12, %c0_13] : memref<2x128xi32, #tpu.memory_space<vmem>>, vector<2x128xi32>
    tpu.vector_store %arg3[%c0_12, %c0_13], %19 {strides = array<i32>} : memref<2x128xi32, #tpu.memory_space<vmem>>, vector<2x128xi32>,
    return
  }
  func.func @transform_0(%arg0: i32, %arg1: memref<1xi32, #tpu.memory_space<smem>>) -> (i32, i32, i32, i32) {
    %c0 = arith.constant 0 : index
    %0 = memref.load %arg1[%c0] : memref<1xi32, #tpu.memory_space<smem>>
    %c0_i32 = arith.constant 0 : i32
    %c0_i32_0 = arith.constant 0 : i32
    %c0_i32_1 = arith.constant 0 : i32
    return %0, %c0_i32, %arg0, %c0_i32_0 : i32, i32, i32, i32
  }
  func.func @transform_1(%arg0: i32, %arg1: memref<1xi32, #tpu.memory_space<smem>>) -> (i32, i32) {
    %c0_i32 = arith.constant 0 : i32
    %c0_i32_0 = arith.constant 0 : i32
    return %arg0, %c0_i32 : i32, i32
  }
}

</mosaic_0001>

<bundles_post_ra>
// kernel: _pred_argmax_impl.1
= control target key start
LH: loop header
LB: loop body
LE: loop exit
PB: predicated region body
PF: predicated region fallthrough
CT: control target
= control target key end

     0   :  { %v63_v4 = vmov 0   ;;  %s91_s0 = inlined_call_operand.<no memory space> [shape: s32[1], index: 0, kind: input, shape index: {}]   ;;  %s92_s1 = inlined_call_operand.vmem [shape: f32[2,4,2,128], index: 1, kind: input, shape index: {}]   ;;  %s93_s2 = inlined_call_operand.vmem [shape: s32[2,128], index: 2, kind: output, shape index: {}]  }
   0x1   :  { %p24_p0 = scmp.lt.s32.totalorder %s91_s0, 1 }
   0x3   :  { %s95_s0 = smov (!%p24_p0, %s91_s0), 1 }
   0x4   :  { %s61_s13 = sshll.u32 %s95_s0, 3 }
   0x5   :  { %s28_s16 = scalar_lea.vmem %s92_s1, %s61_s13 }
   0x6   :  { %v30_v0 = vld [vmem:[%s28_s16] sm:$0x3]  ;;  %v58_v1 = vld [vmem:[%s28_s16 + $0x2] sm:$0x3]  ;;  %v59_v2 = vld [vmem:[%s28_s16 + $0x4] sm:$0x3] }
   0x7   :  { %vm33_vm0 = vcmp.gt.f32.partialorder %v58_v1, %v30_v0  ;;  %v60_v6 = vld [vmem:[%s28_s16 + $0x6] sm:$0x3] }
   0x8   :  { %v34_v3 = vsel %vm33_vm0, %v58_v1, %v30_v0  ;;  %v35_v5 = vsel %vm33_vm0, 1, %v63_v4 }
   0x9   :  { %vm38_vm1 = vcmp.gt.f32.partialorder %v59_v2, %v34_v3 }
   0xa   :  { %v39_v7 = vsel %vm38_vm1, %v59_v2, %v34_v3  ;;  %v40_v8 = vsel %vm38_vm1, 2, %v35_v5 }
   0xb   :  { %vm43_vm2 = vcmp.gt.f32.partialorder %v60_v6, %v39_v7 }
   0xc   :  { %v44_v9 = vsel %vm43_vm2, 3, %v40_v8 }
   0xd   :  { %45 = vst [vmem:[%s93_s2] sm:$0x3] %v44_v9 }

</bundles_post_ra>
